<compile_context>
chip_gen: v7x
topology: tpu7x:2x2x1
jax: 0.10.0
libtpu: 0.0.40
codegen_flags: <defaults>
</compile_context>

<pallas_src>
import math

import numpy as np
import jax
import jax.numpy as jnp
from jax.experimental import pallas as pl
from jax.experimental.pallas import tpu as pltpu

LEAKY_SLOPE = 0.2
BN_EPS = 1e-5
KS = 4            # every DCGAN-encoder conv uses a 4x4 kernel
LANES = 128
MAX_FB = 128      # frames per grid step (M rows of every MXU dot)


def _leaky(x):
    return jnp.where(x > 0, x, LEAKY_SLOPE * x)


def _round_up(x, m):
    return (x + m - 1) // m * m


# ----------------------------------------------------------------------------
# One-time host prep: lower each conv to a dense (in_feat, out_feat) matrix.
# ----------------------------------------------------------------------------
def _conv_to_dense_matrix(w_oihw, in_h, in_w, stride, pad):
    """PyTorch conv weight (Co, Ci, KH, KW) -> dense (in_h*in_w*Ci, out_h*out_w*Co).

    With x_flat in NHWC order ((h*in_w + w)*Ci + ci) and y_flat ordered
    ((ho*out_w + wo)*Co + co),  y_flat = x_flat @ M.  Zero entries encode the
    stride / padding pattern, so the conv becomes a single MXU matmul and no
    im2col gathering is needed inside the kernel.
    """
    w = np.asarray(w_oihw, np.float32)
    co, ci, kh_sz, kw_sz = w.shape
    out_h = (in_h + 2 * pad - kh_sz) // stride + 1
    out_w = (in_w + 2 * pad - kw_sz) // stride + 1
    m = np.zeros((in_h * in_w * ci, out_h * out_w * co), np.float32)
    for ho in range(out_h):
        for wo in range(out_w):
            col0 = (ho * out_w + wo) * co
            for kh in range(kh_sz):
                for kw in range(kw_sz):
                    hi = ho * stride + kh - pad
                    wi = wo * stride + kw - pad
                    if 0 <= hi < in_h and 0 <= wi < in_w:
                        for c_in in range(ci):
                            row = (hi * in_w + wi) * ci + c_in
                            m[row, col0:col0 + co] = w[:, c_in, kh, kw]
    return m, out_h, out_w


# ----------------------------------------------------------------------------
# Kernels
# ----------------------------------------------------------------------------
def _encoder_stage1_kernel(x_ref, w1_ref, w2_ref, y_ref, sum_ref, sq_ref):
    """conv1 + LeakyReLU + conv2 (pre-BN) for one frame block, plus per-block
    BN partial sums / sums-of-squares (kept as 8 sublane-partial rows)."""
    x = x_ref[...].astype(jnp.bfloat16)                         # (fb, H*W*C)
    a1 = jnp.dot(x, w1_ref[...], preferred_element_type=jnp.float32)
    a1 = _leaky(a1)                                             # (fb, 512) f32
    y = jnp.dot(a1.astype(jnp.bfloat16), w2_ref[...],
                preferred_element_type=jnp.float32)             # (fb, 256) f32
    y_ref[...] = y

    fb, feat = y.shape
    yg = y.reshape(fb // 8, 8, feat)                            # row-group split
    sum_ref[...] = jnp.sum(yg, axis=0)                          # (8, feat)
    sq_ref[...] = jnp.sum(yg * yg, axis=0)                      # (8, feat)


def _encoder_stage2_kernel(y_ref, scale_ref, shift_ref, w3_ref, o_ref):
    """BatchNorm (precomputed per-lane scale/shift) + LeakyReLU + conv3 (full
    4x4 contraction, lane-dense 128-wide output) for one frame block."""
    a2 = _leaky(y_ref[...] * scale_ref[...] + shift_ref[...])   # (fb, 256) f32
    o_ref[...] = jnp.dot(a2.astype(jnp.bfloat16), w3_ref[...],
                         preferred_element_type=jnp.float32)    # (fb, 128) f32


# ----------------------------------------------------------------------------
# Wrapper
# ----------------------------------------------------------------------------
def encoder_forward(video, params, image_latent_size):
    """video: (N, T, C, H, W) -> (input_z (N, T, image_latent_size), 0)."""
    n, t, c, h, w = video.shape
    nt = n * t
    w1m, w2m, w3m = params["w1m"], params["w2m"], params["w3m"]
    gamma, beta = params["gamma"], params["beta"]

    in_feat = w1m.shape[0]          # H*W*C            (256 for 16x16x1)
    mid_feat = w1m.shape[1]         # 8*8*ngf          (512)
    y_feat = w2m.shape[1]           # 4*4*2ngf         (256)
    out_pad = w3m.shape[1]          # latent padded to 128 lanes
    c2 = gamma.shape[0]             # 2*ngf BN channels
    n_pos = y_feat // c2            # conv2 spatial positions (16)
    assert in_feat == h * w * c, "params were built for a different geometry"
    assert in_feat % LANES == 0 and mid_feat % LANES == 0
    assert y_feat % LANES == 0 and out_pad % LANES == 0
    assert image_latent_size <= out_pad
    # TODO(synk): deeper encoders (image_size=64 -> 5 layers) need two more
    # fused stride-2 conv-as-matmul stages in kernel A.

    # Lane-dense, frame-major input: (NT, H*W*C) in NHWC feature order (matches
    # the dense conv matrices).  Pad frames to a multiple of fb with zeros --
    # zero frames contribute exactly 0 to the BN sums (convs have no bias) and
    # their output rows are sliced off below.
    x = jnp.transpose(video.reshape(nt, c, h, w), (0, 2, 3, 1)).reshape(nt, in_feat)
    fb = min(MAX_FB, _round_up(nt, 8))
    nt_pad = _round_up(nt, fb)
    if nt_pad != nt:
        x = jnp.pad(x, ((0, nt_pad - nt), (0, 0)))
    n_blocks = nt_pad // fb

    # ---- kernel A: conv1 + LReLU + conv2 (pre-BN) + BN partial sums ---------
    flops1 = 2 * nt_pad * (in_feat * mid_feat + mid_feat * y_feat)
    bytes1 = (nt_pad * in_feat * 4 + w1m.size * 2 + w2m.size * 2
              + nt_pad * y_feat * 4 + 2 * n_blocks * 8 * y_feat * 4)
    y_cache, psum, psq = pl.pallas_call(
        _encoder_stage1_kernel,
        out_shape=(
            jax.ShapeDtypeStruct((nt_pad, y_feat), jnp.float32),       # pre-BN cache
            jax.ShapeDtypeStruct((n_blocks * 8, y_feat), jnp.float32), # partial sums
            jax.ShapeDtypeStruct((n_blocks * 8, y_feat), jnp.float32), # partial sumsq
        ),
        grid_spec=pltpu.PrefetchScalarGridSpec(
            num_scalar_prefetch=0,
            grid=(n_blocks,),
            in_specs=[
                pl.BlockSpec((fb, in_feat), lambda b: (b, 0)),
                pl.BlockSpec(w1m.shape, lambda b: (0, 0)),
                pl.BlockSpec(w2m.shape, lambda b: (0, 0)),
            ],
            out_specs=[
                pl.BlockSpec((fb, y_feat), lambda b: (b, 0)),
                pl.BlockSpec((8, y_feat), lambda b: (b, 0)),
                pl.BlockSpec((8, y_feat), lambda b: (b, 0)),
            ],
        ),
        compiler_params=pltpu.CompilerParams(
            dimension_semantics=("parallel",),      # frame blocks shard on v7x TCs
            vmem_limit_bytes=32 * 1024 * 1024,      # usage is <2 MiB; fits v7x's 64 MiB
        ),
        cost_estimate=pl.CostEstimate(flops=int(flops1), transcendentals=0,
                                      bytes_accessed=int(bytes1)),
    )(x, w1m, w2m)

    # ---- tiny BN finalize (a few hundred floats) between the two calls ------
    # Exact training-mode batch statistics over (NT frames x 16 positions).
    n_rows = nt * n_pos                                   # real frames only
    s = jnp.sum(psum, axis=0).reshape(n_pos, c2).sum(axis=0)
    sq = jnp.sum(psq, axis=0).reshape(n_pos, c2).sum(axis=0)
    mean = s / n_rows
    var = sq / n_rows - mean * mean                       # biased var (BN train mode)
    inv_std = jax.lax.rsqrt(var + BN_EPS)
    scale_c = gamma * inv_std
    shift_c = beta - mean * scale_c
    scale = jnp.tile(scale_c, n_pos).reshape(1, y_feat)   # per-lane (pos, channel)
    shift = jnp.tile(shift_c, n_pos).reshape(1, y_feat)

    # ---- kernel B: BN epilogue + LReLU + conv3 -------------------------------
    flops2 = 2 * nt_pad * y_feat * out_pad
    bytes2 = (nt_pad * y_feat * 4 + 2 * y_feat * 4 + w3m.size * 2
              + nt_pad * out_pad * 4)
    out = pl.pallas_call(
        _encoder_stage2_kernel,
        out_shape=jax.ShapeDtypeStruct((nt_pad, out_pad), jnp.float32),
        grid_spec=pltpu.PrefetchScalarGridSpec(
            num_scalar_prefetch=0,
            grid=(n_blocks,),
            in_specs=[
                pl.BlockSpec((fb, y_feat), lambda b: (b, 0)),
                pl.BlockSpec((1, y_feat), lambda b: (0, 0)),
                pl.BlockSpec((1, y_feat), lambda b: (0, 0)),
                pl.BlockSpec(w3m.shape, lambda b: (0, 0)),
            ],
            out_specs=pl.BlockSpec((fb, out_pad), lambda b: (b, 0)),
        ),
        compiler_params=pltpu.CompilerParams(
            dimension_semantics=("parallel",),
            vmem_limit_bytes=32 * 1024 * 1024,
        ),
        cost_estimate=pl.CostEstimate(flops=int(flops2), transcendentals=0,
                                      bytes_accessed=int(bytes2)),
    )(y_cache, scale, shift, w3m)

    input_z = out[:nt, :image_latent_size].reshape(n, t, image_latent_size)
    return input_z, 0


# ----------------------------------------------------------------------------
# Parameters (raw PyTorch-layout for the reference + prepped kernel weights)
# ----------------------------------------------------------------------------
def init_params(key, n_channels, image_size, ngf, image_latent_size):
    n_layers = int(math.log2(image_size)) - 1
    assert n_layers == 3, "this script instantiates the image_size=16 encoder"
    k1, k2, k3, k4, k5 = jax.random.split(key, 5)
    w1 = jax.random.normal(k1, (ngf, n_channels, KS, KS), jnp.float32) * 0.1
    w2 = jax.random.normal(k2, (2 * ngf, ngf, KS, KS), jnp.float32) * 0.1
    w3 = jax.random.normal(k3, (image_latent_size, 2 * ngf, KS, KS),
                           jnp.float32) * 0.1
    gamma = 1.0 + 0.1 * jax.random.normal(k4, (2 * ngf,), jnp.float32)
    beta = 0.1 * jax.random.normal(k5, (2 * ngf,), jnp.float32)
    raw = dict(w1=w1, w2=w2, w3=w3, gamma=gamma, beta=beta)

    # Conv-as-matrix kernel weights (one-time host prep): bf16 for the MXU,
    # final layer zero-padded to a lane-dense 128-wide output.
    m1, h1, w1sp = _conv_to_dense_matrix(w1, image_size, image_size, 2, 1)  # (256, 512)
    m2, h2, w2sp = _conv_to_dense_matrix(w2, h1, w1sp, 2, 1)                # (512, 256)
    m3, h3, w3sp = _conv_to_dense_matrix(w3, h2, w2sp, 1, 0)                # (256, latent)
    assert h3 == 1 and w3sp == 1
    out_pad = _round_up(image_latent_size, LANES)
    m3 = np.pad(m3, ((0, 0), (0, out_pad - image_latent_size)))
    prep = dict(
        w1m=jnp.asarray(m1, jnp.bfloat16),
        w2m=jnp.asarray(m2, jnp.bfloat16),
        w3m=jnp.asarray(m3, jnp.bfloat16),
        gamma=gamma, beta=beta,
    )
    return raw, prep


# ----------------------------------------------------------------------------
# Pure-JAX reference (PyTorch semantics, same mixed-precision policy: bf16
# conv inputs with f32 accumulation; f32 BatchNorm / LeakyReLU epilogues)
# ----------------------------------------------------------------------------
def reference_forward(video, raw):
    n, t, c, h, w = video.shape
    x = video.reshape(n * t, c, h, w)
    dn = ("NCHW", "OIHW", "NCHW")
    hi = jax.lax.Precision.HIGHEST

    y1 = jax.lax.conv_general_dilated(
        x.astype(jnp.bfloat16), raw["w1"].astype(jnp.bfloat16), (2, 2),
        [(1, 1), (1, 1)], dimension_numbers=dn, precision=hi,
        preferred_element_type=jnp.float32)
    y1 = jnp.where(y1 > 0, y1, LEAKY_SLOPE * y1)

    y2 = jax.lax.conv_general_dilated(
        y1.astype(jnp.bfloat16), raw["w2"].astype(jnp.bfloat16), (2, 2),
        [(1, 1), (1, 1)], dimension_numbers=dn, precision=hi,
        preferred_element_type=jnp.float32)
    mean = jnp.mean(y2, axis=(0, 2, 3), keepdims=True)
    var = jnp.mean((y2 - mean) ** 2, axis=(0, 2, 3), keepdims=True)
    y2 = (y2 - mean) * jax.lax.rsqrt(var + BN_EPS)
    y2 = y2 * raw["gamma"].reshape(1, -1, 1, 1) + raw["beta"].reshape(1, -1, 1, 1)
    y2 = jnp.where(y2 > 0, y2, LEAKY_SLOPE * y2)

    y3 = jax.lax.conv_general_dilated(
        y2.astype(jnp.bfloat16), raw["w3"].astype(jnp.bfloat16), (1, 1),
        [(0, 0), (0, 0)], dimension_numbers=dn, precision=hi,
        preferred_element_type=jnp.float32)
    return y3.reshape(n, t, -1)


if __name__ == "__main__":
    # Small config consistent with the module:
    # n_channels=1, image_size=16 (=> n_layers=3), ngf=8, image_latent_size=32
    B, T, C, H, W = 2, 8, 1, 16, 16
    NGF, LATENT = 8, 32

    key = jax.random.PRNGKey(0)
    k_param, k_data = jax.random.split(key)
    raw, prep = init_params(k_param, C, H, NGF, LATENT)
    video = jax.random.normal(k_data, (B, T, C, H, W), jnp.float32)

    fwd = jax.jit(lambda v: encoder_forward(v, prep, LATENT))
    input_z, encoder_outputs = fwd(video)
    input_z = jax.block_until_ready(input_z)

    assert input_z.shape == (B, T, LATENT), input_z.shape
    assert encoder_outputs == 0

    ref = reference_forward(video, raw)
    max_err = float(jnp.max(jnp.abs(input_z - ref)))
    # Tolerance covers bf16 re-quantization of intermediates (both sides use
    # bf16 MXU/conv inputs with f32 accumulation, but summation order differs).
    assert jnp.allclose(input_z, ref, rtol=5e-3, atol=5e-3), max_err

    print("KERNEL_OK")
</pallas_src>

<mosaic_0001>
module attributes {stable_mosaic.version = 11 : i64} {
  func.func @_encoder_stage1_kernel(%arg0: i32, %arg1: memref<16x256xf32, #tpu.memory_space<vmem>>, %arg2: memref<256x512xbf16, #tpu.memory_space<vmem>>, %arg3: memref<512x256xbf16, #tpu.memory_space<vmem>>, %arg4: memref<16x256xf32, #tpu.memory_space<vmem>>, %arg5: memref<8x256xf32, #tpu.memory_space<vmem>>, %arg6: memref<8x256xf32, #tpu.memory_space<vmem>>) attributes {dimension_semantics = [#tpu.dimension_semantics<parallel>], iteration_bounds = array<i64: 1>, scalar_prefetch = 0 : i64, scratch_operands = 0 : i64, tpu.core_type = #tpu.core_type<tc>, window_params = [{transform_indices = @transform_0, window_bounds = array<i64: 16, 256>}, {pipeline_mode = #tpu.pipeline_mode<synchronous>, transform_indices = @transform_1, window_bounds = array<i64: 256, 512>}, {pipeline_mode = #tpu.pipeline_mode<synchronous>, transform_indices = @transform_2, window_bounds = array<i64: 512, 256>}, {transform_indices = @transform_3, window_bounds = array<i64: 16, 256>}, {transform_indices = @transform_4, window_bounds = array<i64: 8, 256>}, {transform_indices = @transform_5, window_bounds = array<i64: 8, 256>}]} {
    %c0 = arith.constant 0 : index
    %c0_0 = arith.constant 0 : index
    %0 = vector.load %arg1[%c0, %c0_0] : memref<16x256xf32, #tpu.memory_space<vmem>>, vector<16x256xf32>
    %1 = arith.truncf %0 : vector<16x256xf32> to vector<16x256xbf16>
    %c0_1 = arith.constant 0 : index
    %c0_2 = arith.constant 0 : index
    %2 = vector.load %arg2[%c0_1, %c0_2] : memref<256x512xbf16, #tpu.memory_space<vmem>>, vector<256x512xbf16>
    %cst = arith.constant dense<0.000000e+00> : vector<16x512xf32>
    %3 = tpu.matmul %1, %2, %cst {dimension_numbers = #tpu.dot_dimension_numbers<[1], [0], [0], [1], [0, 0, 1, 1], [], []>} : vector<16x256xbf16>, vector<256x512xbf16>, vector<16x512xf32> -> vector<16x512xf32>
    %cst_3 = arith.constant 0.000000e+00 : f32
    %4 = vector.broadcast %cst_3 : f32 to vector<16x512xf32>
    %5 = arith.cmpf ogt, %3, %4 : vector<16x512xf32>
    %cst_4 = arith.constant 2.000000e-01 : f32
    %6 = vector.broadcast %cst_4 : f32 to vector<16x512xf32>
    %7 = arith.mulf %6, %3 : vector<16x512xf32>
    %8 = arith.select %5, %3, %7 : vector<16x512xi1>, vector<16x512xf32>
    %9 = arith.truncf %8 : vector<16x512xf32> to vector<16x512xbf16>
    %c0_5 = arith.constant 0 : index
    %c0_6 = arith.constant 0 : index
    %10 = vector.load %arg3[%c0_5, %c0_6] : memref<512x256xbf16, #tpu.memory_space<vmem>>, vector<512x256xbf16>
    %cst_7 = arith.constant dense<0.000000e+00> : vector<16x256xf32>
    %11 = tpu.matmul %9, %10, %cst_7 {dimension_numbers = #tpu.dot_dimension_numbers<[1], [0], [0], [1], [0, 0, 1, 1], [], []>} : vector<16x512xbf16>, vector<512x256xbf16>, vector<16x256xf32> -> vector<16x256xf32>
    %c0_8 = arith.constant 0 : index
    %c0_9 = arith.constant 0 : index
    %12 = vector.load %arg4[%c0_8, %c0_9] : memref<16x256xf32, #tpu.memory_space<vmem>>, vector<16x256xf32>
    tpu.vector_store %arg4[%c0_8, %c0_9], %11 {strides = array<i32>} : memref<16x256xf32, #tpu.memory_space<vmem>>, vector<16x256xf32>,
    %13 = vector.shape_cast %11 : vector<16x256xf32> to vector<2x8x256xf32>
    %cst_10 = arith.constant dense<0.000000e+00> : vector<8x256xf32>
    %14 = vector.multi_reduction <add>, %13, %cst_10 [0] : vector<2x8x256xf32> to vector<8x256xf32>
    %c0_11 = arith.constant 0 : index
    %c0_12 = arith.constant 0 : index
    %15 = vector.load %arg5[%c0_11, %c0_12] : memref<8x256xf32, #tpu.memory_space<vmem>>, vector<8x256xf32>
    tpu.vector_store %arg5[%c0_11, %c0_12], %14 {strides = array<i32>} : memref<8x256xf32, #tpu.memory_space<vmem>>, vector<8x256xf32>,
    %16 = arith.mulf %13, %13 : vector<2x8x256xf32>
    %cst_13 = arith.constant dense<0.000000e+00> : vector<8x256xf32>
    %17 = vector.multi_reduction <add>, %16, %cst_13 [0] : vector<2x8x256xf32> to vector<8x256xf32>
    %c0_14 = arith.constant 0 : index
    %c0_15 = arith.constant 0 : index
    %18 = vector.load %arg6[%c0_14, %c0_15] : memref<8x256xf32, #tpu.memory_space<vmem>>, vector<8x256xf32>
    tpu.vector_store %arg6[%c0_14, %c0_15], %17 {strides = array<i32>} : memref<8x256xf32, #tpu.memory_space<vmem>>, vector<8x256xf32>,
    return
  }
  func.func @transform_0(%arg0: i32) -> (i32, i32) {
    %c0_i32 = arith.constant 0 : i32
    %c0_i32_0 = arith.constant 0 : i32
    return %arg0, %c0_i32 : i32, i32
  }
  func.func @transform_1(%arg0: i32) -> (i32, i32) {
    %c0_i32 = arith.constant 0 : i32
    %c0_i32_0 = arith.constant 0 : i32
    %c0_i32_1 = arith.constant 0 : i32
    return %c0_i32, %c0_i32_0 : i32, i32
  }
  func.func @transform_2(%arg0: i32) -> (i32, i32) {
    %c0_i32 = arith.constant 0 : i32
    %c0_i32_0 = arith.constant 0 : i32
    %c0_i32_1 = arith.constant 0 : i32
    return %c0_i32, %c0_i32_0 : i32, i32
  }
  func.func @transform_3(%arg0: i32) -> (i32, i32) {
    %c0_i32 = arith.constant 0 : i32
    %c0_i32_0 = arith.constant 0 : i32
    return %arg0, %c0_i32 : i32, i32
  }
  func.func @transform_4(%arg0: i32) -> (i32, i32) {
    %c0_i32 = arith.constant 0 : i32
    %c0_i32_0 = arith.constant 0 : i32
    return %arg0, %c0_i32 : i32, i32
  }
  func.func @transform_5(%arg0: i32) -> (i32, i32) {
    %c0_i32 = arith.constant 0 : i32
    %c0_i32_0 = arith.constant 0 : i32
    return %arg0, %c0_i32 : i32, i32
  }
}

module attributes {stable_mosaic.version = 11 : i64} {
  func.func @_encoder_stage2_kernel(%arg0: i32, %arg1: memref<16x256xf32, #tpu.memory_space<vmem>>, %arg2: memref<1x256xf32, #tpu.memory_space<vmem>>, %arg3: memref<1x256xf32, #tpu.memory_space<vmem>>, %arg4: memref<256x128xbf16, #tpu.memory_space<vmem>>, %arg5: memref<16x128xf32, #tpu.memory_space<vmem>>) attributes {dimension_semantics = [#tpu.dimension_semantics<parallel>], iteration_bounds = array<i64: 1>, scalar_prefetch = 0 : i64, scratch_operands = 0 : i64, tpu.core_type = #tpu.core_type<tc>, window_params = [{transform_indices = @transform_0, window_bounds = array<i64: 16, 256>}, {pipeline_mode = #tpu.pipeline_mode<synchronous>, transform_indices = @transform_1, window_bounds = array<i64: 1, 256>}, {pipeline_mode = #tpu.pipeline_mode<synchronous>, transform_indices = @transform_2, window_bounds = array<i64: 1, 256>}, {pipeline_mode = #tpu.pipeline_mode<synchronous>, transform_indices = @transform_3, window_bounds = array<i64: 256, 128>}, {transform_indices = @transform_4, window_bounds = array<i64: 16, 128>}]} {
    %c0 = arith.constant 0 : index
    %c0_0 = arith.constant 0 : index
    %0 = vector.load %arg1[%c0, %c0_0] : memref<16x256xf32, #tpu.memory_space<vmem>>, vector<16x256xf32>
    %c0_1 = arith.constant 0 : index
    %c0_2 = arith.constant 0 : index
    %1 = vector.load %arg2[%c0_1, %c0_2] : memref<1x256xf32, #tpu.memory_space<vmem>>, vector<1x256xf32>
    %2 = vector.broadcast %1 : vector<1x256xf32> to vector<16x256xf32>
    %3 = arith.mulf %0, %2 : vector<16x256xf32>
    %c0_3 = arith.constant 0 : index
    %c0_4 = arith.constant 0 : index
    %4 = vector.load %arg3[%c0_3, %c0_4] : memref<1x256xf32, #tpu.memory_space<vmem>>, vector<1x256xf32>
    %5 = vector.broadcast %4 : vector<1x256xf32> to vector<16x256xf32>
    %6 = arith.addf %3, %5 : vector<16x256xf32>
    %cst = arith.constant 0.000000e+00 : f32
    %7 = vector.broadcast %cst : f32 to vector<16x256xf32>
    %8 = arith.cmpf ogt, %6, %7 : vector<16x256xf32>
    %cst_5 = arith.constant 2.000000e-01 : f32
    %9 = vector.broadcast %cst_5 : f32 to vector<16x256xf32>
    %10 = arith.mulf %9, %6 : vector<16x256xf32>
    %11 = arith.select %8, %6, %10 : vector<16x256xi1>, vector<16x256xf32>
    %12 = arith.truncf %11 : vector<16x256xf32> to vector<16x256xbf16>
    %c0_6 = arith.constant 0 : index
    %c0_7 = arith.constant 0 : index
    %13 = vector.load %arg4[%c0_6, %c0_7] : memref<256x128xbf16, #tpu.memory_space<vmem>>, vector<256x128xbf16>
    %cst_8 = arith.constant dense<0.000000e+00> : vector<16x128xf32>
    %14 = tpu.matmul %12, %13, %cst_8 {dimension_numbers = #tpu.dot_dimension_numbers<[1], [0], [0], [1], [0, 0, 1, 1], [], []>} : vector<16x256xbf16>, vector<256x128xbf16>, vector<16x128xf32> -> vector<16x128xf32>
    %c0_9 = arith.constant 0 : index
    %c0_10 = arith.constant 0 : index
    %15 = vector.load %arg5[%c0_9, %c0_10] : memref<16x128xf32, #tpu.memory_space<vmem>>, vector<16x128xf32>
    tpu.vector_store %arg5[%c0_9, %c0_10], %14 {strides = array<i32>} : memref<16x128xf32, #tpu.memory_space<vmem>>, vector<16x128xf32>,
    return
  }
  func.func @transform_0(%arg0: i32) -> (i32, i32) {
    %c0_i32 = arith.constant 0 : i32
    %c0_i32_0 = arith.constant 0 : i32
    return %arg0, %c0_i32 : i32, i32
  }
  func.func @transform_1(%arg0: i32) -> (i32, i32) {
    %c0_i32 = arith.constant 0 : i32
    %c0_i32_0 = arith.constant 0 : i32
    %c0_i32_1 = arith.constant 0 : i32
    return %c0_i32, %c0_i32_0 : i32, i32
  }
  func.func @transform_2(%arg0: i32) -> (i32, i32) {
    %c0_i32 = arith.constant 0 : i32
    %c0_i32_0 = arith.constant 0 : i32
    %c0_i32_1 = arith.constant 0 : i32
    return %c0_i32, %c0_i32_0 : i32, i32
  }
  func.func @transform_3(%arg0: i32) -> (i32, i32) {
    %c0_i32 = arith.constant 0 : i32
    %c0_i32_0 = arith.constant 0 : i32
    %c0_i32_1 = arith.constant 0 : i32
    return %c0_i32, %c0_i32_0 : i32, i32
  }
  func.func @transform_4(%arg0: i32) -> (i32, i32) {
    %c0_i32 = arith.constant 0 : i32
    %c0_i32_0 = arith.constant 0 : i32
    return %arg0, %c0_i32 : i32, i32
  }
}

</mosaic_0001>

<bundles_post_ra>
// kernel: tile.13
= control target key start
LH: loop header
LB: loop body
LE: loop exit
PB: predicated region body
PF: predicated region fallthrough
CT: control target
= control target key end

     0   :  { %s28_s0 = inlined_call_operand.vmem [shape: f32[16], index: 0, kind: input, shape index: {}]   ;;  %s29_s1 = inlined_call_operand.vmem [shape: f32[16,16], index: 1, kind: output, shape index: {}]  }
   0x1   :  { %v4_v0 = vld [vmem:[%s28_s0] ss:$0 sm:$0xff] }
   0x2   :  { %5 = vst [vmem:[%s29_s1] sm:$0xff] %v4_v0  ;;  %8 = vst [vmem:[%s29_s1 + $0x8] sm:$0xff] %v4_v0 }

// kernel: tile.14
= control target key start
LH: loop header
LB: loop body
LE: loop exit
PB: predicated region body
PF: predicated region fallthrough
CT: control target
= control target key end

     0   :  { %s7_s6 = smov 3  ;;  %s21_s9 = smov 3  ;;  %vm4_vm0 = vcmask 130048   ;;  %vm11_vm1 = vcmask 1048448   ;;  %vm18_vm2 = vcmask 917248   ;;  %vm25_vm3 = vcmask 786048   ;;  %s128_s0 = inlined_call_operand.vmem [shape: f32[16,16], index: 0, kind: input, shape index: {}]   ;;  %s129_s1 = inlined_call_operand.vmem [shape: f32[1,256], index: 1, kind: output, shape index: {}]  }
   0x1   :  { %v66_v0 = vld [vmem:[%s128_s0 + $0x7] ss:$8 sm:%s7_s6]   ;;  %s81_s10 = smov 112   ;;  %v68_v1 = vld [vmem:[%s128_s0 + $0x5] ss:$8 sm:%s21_s9]   ;;  %s14_s13 = smov 3 }
   0x2   :  { %9 = vrot.lane.b32.xlu0 %v66_v0, %s81_s10  ;;  %s82_s14 = smov 80   ;;  %v67_v2 = vld [vmem:[%s128_s0 + $0x6] ss:$8 sm:%s14_s13]   ;;  %s28_s17 = smov 3  ;;  %vm32_vm4 = vcmask 654848   ;;  %vm39_vm5 = vcmask 523648  }
   0x3   :  { %23 = vrot.lane.b32.xlu1 %v68_v1, %s82_s14  ;;  %v69_v3 = vld [vmem:[%s128_s0 + $0x4] ss:$8 sm:%s28_s17]   ;;  %s35_s20 = smov 3  ;;  %s42_s21 = smov 3  ;;  %vm46_vm6 = vcmask 392448   ;;  %vm53_vm7 = vcmask 261248  }
   0x4   :  { %s83_s22 = smov 96   ;;  %s84_s23 = smov 64   ;;  %v70_v4 = vld [vmem:[%s128_s0 + $0x3] ss:$8 sm:%s35_s20]   ;;  %v71_v5 = vld [vmem:[%s128_s0 + $0x2] ss:$8 sm:%s42_s21]  }
   0x5   :  { %s2_s26 = smov 3  ;;  %s49_s29 = smov 3 }
   0x6   :  { %16 = vrot.lane.b32.xlu0 %v67_v2, %s83_s22  ;;  %v3_v6 = vld [vmem:[%s128_s0] ss:$8 sm:%s2_s26]   ;;  %s85_s3 = smov 48   ;;  %s86_s4 = smov 32  }
   0x7   :  { %30 = vrot.lane.b32.xlu1 %v69_v3, %s84_s23  ;;  %5 = vst.msk [vmem:[#allocation0] ss:$8 sm:$0x3] %vm4_vm0, %v3_v6   ;;  %v72_v7 = vld [vmem:[%s128_s0 + $0x1] ss:$8 sm:%s49_s29]   ;;  %s87_s0 = smov 16  }
   0xa   :  { %37 = vrot.lane.b32.xlu0 %v70_v4, %s85_s3 }
   0xb   :  { %44 = vrot.lane.b32.xlu1 %v71_v5, %s86_s4 }
   0xe   :  { %51 = vrot.lane.b32.xlu0 %v72_v7, %s87_s0 }
  0x74   :  { %v10_v8 = vpop.permute.xlu0 %9  }
  0x75   :  { %12 = vst.msk [vmem:[#allocation0] ss:$8 sm:$0x3] %vm11_vm1, %v10_v8   ;;  %v24_v9 = vpop.permute.xlu1 %23  }
  0x78   :  { %v17_v10 = vpop.permute.xlu0 %16  }
  0x79   :  { %19 = vst.msk [vmem:[#allocation0] ss:$8 sm:$0x3] %vm18_vm2, %v17_v10   ;;  %v31_v11 = vpop.permute.xlu1 %30  }
  0x7a   :  { %26 = vst.msk [vmem:[#allocation0] ss:$8 sm:$0x3] %vm25_vm3, %v24_v9  }
  0x7b   :  { %33 = vst.msk [vmem:[#allocation0] ss:$8 sm:$0x3] %vm32_vm4, %v31_v11  }
  0x7c   :  { %v38_v12 = vpop.permute.xlu0 %37  }
  0x7d   :  { %40 = vst.msk [vmem:[#allocation0] ss:$8 sm:$0x3] %vm39_vm5, %v38_v12   ;;  %v45_v13 = vpop.permute.xlu1 %44  }
  0x7e   :  { %47 = vst.msk [vmem:[#allocation0] ss:$8 sm:$0x3] %vm46_vm6, %v45_v13  }
  0x80   :  { %v52_v14 = vpop.permute.xlu0 %51  }
  0x81   :  { %54 = vst.msk [vmem:[#allocation0] ss:$8 sm:$0x3] %vm53_vm7, %v52_v14  }
  0x88   :  { %v58_v15 = vld [vmem:[#allocation0] sm:$0x1]  ;;  %v62_v16 = vld [vmem:[#allocation0 + $0x8] sm:$0x1] }
  0x89   :  { %60 = vst [vmem:[%s129_s1] sm:$0x1] %v58_v15  ;;  %73 = vst [vmem:[%s129_s1 + $0x1] sm:$0x1] %v62_v16 }

// kernel: _lambda_.3
= control target key start
LH: loop header
LB: loop body
LE: loop exit
PB: predicated region body
PF: predicated region fallthrough
CT: control target
= control target key end

     0   :  { %v24_v5 = vlaneseq  ;;  %s394_s3 = inlined_call_operand.vmem [shape: bf16[256,128], index: 3, kind: input, shape index: {}]   ;;  %s395_s0 = inlined_call_operand.vmem [shape: f32[16,256], index: 0, kind: input, shape index: {}]   ;;  %s396_s1 = inlined_call_operand.vmem [shape: f32[1,256], index: 1, kind: input, shape index: {}]   ;;  %s397_s2 = inlined_call_operand.vmem [shape: f32[1,256], index: 2, kind: input, shape index: {}]   ;;  %s398_s4 = inlined_call_operand.vmem [shape: f32[16,128], index: 4, kind: output, shape index: {}]  }
   0x1   :  { %v281_v0 = vld [vmem:[%s394_s3 + $0x40] sm:$0xff]   ;;  %v283_v2 = vld [vmem:[%s394_s3 + $0x48] sm:$0xff]   ;;  %v285_v4 = vld [vmem:[%s394_s3 + $0x50] sm:$0xff]  }
   0x2   :  { %v282_v1 = vld [vmem:[%s394_s3] sm:$0xff]   ;;  %259 = vmatprep.subr.bf16.mxu0 %v281_v0  ;;  %v284_v3 = vld [vmem:[%s394_s3 + $0x8] sm:$0xff]   ;;  %v286_v6 = vld [vmem:[%s394_s3 + $0x10] sm:$0xff]   ;;  %v25_v8 = vshrl.u32 %v24_v5, 7 }
   0x3   :  { %260 = vmatpush3.bf16.msra.mxu0 %v282_v1  ;;  %v287_v7 = vld [vmem:[%s394_s3 + $0x58] sm:$0xff]   ;;  %v289_v10 = vld [vmem:[%s394_s3 + $0x60] sm:$0xff]   ;;  %v291_v14 = vld [vmem:[%s394_s3 + $0x68] sm:$0xff]  }
   0x4   :  { %261 = vmatprep.subr.bf16.mxu0 %v283_v2  ;;  %v288_v9 = vld [vmem:[%s394_s3 + $0x18] sm:$0xff]   ;;  %v26_v11 = vsub.s32 0, %v25_v8  ;;  %v30_v12 = vsub.s32 1, %v25_v8  ;;  %v290_v13 = vld [vmem:[%s394_s3 + $0x20] sm:$0xff]   ;;  %v19_v15 = vld [vmem:[%s395_s0 + $0x8] sm:$0xff] }
   0x5   :  { %v21_v16 = vld [vmem:[%s395_s0 + $0x18] sm:$0xff]  ;;  %v22_v17 = vld [vmem:[%s396_s1] sm:$0x3]  ;;  %v20_v22 = vld [vmem:[%s395_s0 + $0x10] sm:$0xff] }
   0x6   :  { %v27_v18 = vrot.slane %v22_v17, %v26_v11  ;;  %v31_v19 = vrot.slane %v22_v17, %v30_v12  ;;  %v38_v20 = vld [vmem:[%s397_s2] sm:$0x3]  ;;  %v292_v25 = vld [vmem:[%s394_s3 + $0x28] sm:$0xff]   ;;  %v293_v30 = vld [vmem:[%s394_s3 + $0x70] sm:$0xff]  }
   0x7   :  { %262 = vmatpush3.bf16.msra.mxu0 %v284_v3  ;;  %v18_v21 = vld [vmem:[%s395_s0] sm:$0xff]  ;;  %v43_v23 = vrot.slane %v38_v20, %v26_v11  ;;  %v47_v24 = vrot.slane %v38_v20, %v30_v12  ;;  %v294_v35 = vld [vmem:[%s394_s3 + $0x30] sm:$0xff]   ;;  %v295_v36 = vld [vmem:[%s394_s3 + $0x78] sm:$0xff]  }
   0x8   :  { %263 = vmatprep.subr.bf16.mxu0 %v285_v4  ;;  %v35_v26 = vmul.f32 %v31_v19, %v19_v15  ;;  %v37_v27 = vmul.f32 %v31_v19, %v21_v16  ;;  %v34_v28 = vmul.f32 %v27_v18, %v18_v21  ;;  %v36_v29 = vmul.f32 %v27_v18, %v20_v22  ;;  %v296_v44 = vld [vmem:[%s394_s3 + $0x38] sm:$0xff]  }
   0xa   :  { %v51_v31 = vadd.f32 %v47_v24, %v35_v26  ;;  %v53_v32 = vadd.f32 %v47_v24, %v37_v27  ;;  %v50_v33 = vadd.f32 %v43_v23, %v34_v28  ;;  %v52_v34 = vadd.f32 %v43_v23, %v36_v29 }
   0xb   :  { %264 = vmatpush3.bf16.msra.mxu0 %v286_v6 }
   0xc   :  { %265 = vmatprep.subr.bf16.mxu0 %v287_v7  ;;  %vm55_vm0 = vcmp.gt.f32.partialorder %v51_v31, 0.0  ;;  %vm57_vm1 = vcmp.gt.f32.partialorder %v53_v32, 0.0  ;;  %v59_v37 = vmul.f32 0.2, %v51_v31  ;;  %v61_v38 = vmul.f32 0.2, %v53_v32 }
   0xd   :  { %vm54_vm2 = vcmp.gt.f32.partialorder %v50_v33, 0.0  ;;  %vm56_vm3 = vcmp.gt.f32.partialorder %v52_v34, 0.0  ;;  %v58_v39 = vmul.f32 0.2, %v50_v33  ;;  %v60_v40 = vmul.f32 0.2, %v52_v34 }
   0xe   :  { %v63_v41 = vsel %vm55_vm0, %v51_v31, %v59_v37  ;;  %v65_v42 = vsel %vm57_vm1, %v53_v32, %v61_v38 }
   0xf   :  { %266 = vmatpush3.bf16.msra.mxu0 %v288_v9  ;;  %v67_v43 = vpack.c.bf16 %v65_v42, %v63_v41  ;;  %v62_v45 = vsel %vm54_vm2, %v50_v33, %v58_v39  ;;  %v64_v46 = vsel %vm56_vm3, %v52_v34, %v60_v40 }
  0x10   :  { %267 = vmatprep.subr.bf16.mxu0 %v289_v10  ;;  %v66_v47 = vpack.c.bf16 %v64_v46, %v62_v45 }
  0x11   :  { %228 = vmatprep.mubr.bf16.mxu0 %v67_v43 }
  0x13   :  { %268 = vmatpush3.bf16.msra.mxu0 %v290_v13 }
  0x14   :  { %269 = vmatprep.subr.bf16.mxu0 %v291_v14 }
  0x17   :  { %270 = vmatpush3.bf16.msra.mxu0 %v292_v25 }
  0x18   :  { %271 = vmatprep.subr.bf16.mxu0 %v293_v30 }
  0x1b   :  { %272 = vmatpush3.bf16.msra.mxu0 %v294_v35 }
  0x1c   :  { %273 = vmatprep.subr.bf16.mxu0 %v295_v36 }
  0x1f   :  { %274 = vmatpush3.bf16.msra.mxu0 %v296_v44 }
  0x22   :  { %229 = vmatmul.mubr.bf16.vlgmr.msra.gmra.mrb[0].mxu0 %v66_v47 }
  0xf5   :  { %v275_v48 = vpop.f32.mrb[0].mxu0 }
  0xf6   :  { %v276_v49 = vpop.f32.mrb[1].mxu0 }
  0xf7   :  { %v277_v50 = vadd.f32 %v276_v49, %v275_v48  ;;  %v278_v51 = vpop.f32.mrb[2].mxu0 }
  0xf8   :  { %v279_v52 = vpop.f32.mrb[3].mxu0 }
  0xf9   :  { %237 = vst [vmem:[%s398_s4] sm:$0xff] %v277_v50  ;;  %v280_v53 = vadd.f32 %v279_v52, %v278_v51 }
  0xfb   :  { %238 = vst [vmem:[%s398_s4 + $0x8] sm:$0xff] %v280_v53 }

// kernel: _lambda_.2
= control target key start
LH: loop header
LB: loop body
LE: loop exit
PB: predicated region body
PF: predicated region fallthrough
CT: control target
= control target key end

     0   :  { %s1801_s1 = inlined_call_operand.vmem [shape: bf16[256,512], index: 1, kind: input, shape index: {}]   ;;  %s1802_s0 = inlined_call_operand.vmem [shape: f32[16,256], index: 0, kind: input, shape index: {}]   ;;  %s1803_s2 = inlined_call_operand.vmem [shape: bf16[512,256], index: 2, kind: input, shape index: {}]   ;;  %s1804_s3 = inlined_call_operand.vmem [shape: f32[16,256], index: 3, kind: output, shape index: {0}]   ;;  %s1805_s4 = inlined_call_operand.vmem [shape: f32[8,256], index: 4, kind: output, shape index: {1}]   ;;  %s1806_s5 = inlined_call_operand.vmem [shape: f32[8,256], index: 5, kind: output, shape index: {2}]  }
   0x1   :  { %v1151_v0 = vld [vmem:[%s1801_s1 + $0x4] ss:$16 sps:$4 sm:$0xff]   ;;  %v1153_v1 = vld [vmem:[%s1801_s1] ss:$16 sps:$4 sm:$0xff]   ;;  %v18_v13 = vld [vmem:[%s1802_s0 + $0x8] sm:$0xff] }
   0x2   :  { %407 = vmatprep.subr.bf16.mxu1 %v1151_v0  ;;  %v1154_v2 = vld [vmem:[%s1801_s1 + $0x24] ss:$16 sps:$4 sm:$0xff]   ;;  %v1156_v3 = vld [vmem:[%s1801_s1 + $0x20] ss:$16 sps:$4 sm:$0xff]   ;;  %v20_v14 = vld [vmem:[%s1802_s0 + $0x18] sm:$0xff] }
   0x3   :  { %408 = vmatpush1.bf16.msra.mxu1 %v1153_v1  ;;  %v1157_v4 = vld [vmem:[%s1801_s1 + $0x44] ss:$16 sps:$4 sm:$0xff]   ;;  %v1159_v5 = vld [vmem:[%s1801_s1 + $0x40] ss:$16 sps:$4 sm:$0xff]   ;;  %v1418_v15 = vpack.c.bf16 %v20_v14, %v18_v13  ;;  %v1201_v46 = vld [vmem:[%s1801_s1 + $0xc] ss:$16 sps:$4 sm:$0xff]  }
   0x4   :  { %409 = vmatprep.subr.bf16.mxu1 %v1154_v2  ;;  %v1160_v6 = vld [vmem:[%s1801_s1 + $0x64] ss:$16 sps:$4 sm:$0xff]   ;;  %v1162_v7 = vld [vmem:[%s1801_s1 + $0x60] ss:$16 sps:$4 sm:$0xff]   ;;  %v1199_v49 = vld [vmem:[%s1801_s1 + $0x8] ss:$16 sps:$4 sm:$0xff]  }
   0x5   :  { %v1163_v8 = vld [vmem:[%s1801_s1 + $0x84] ss:$16 sps:$4 sm:$0xff]   ;;  %v1165_v9 = vld [vmem:[%s1801_s1 + $0x80] ss:$16 sps:$4 sm:$0xff]   ;;  %439 = vmatprep.mubr.bf16.mxu1 %v1418_v15  ;;  %v1204_v51 = vld [vmem:[%s1801_s1 + $0x2c] ss:$16 sps:$4 sm:$0xff]  }
   0x6   :  { %v1166_v10 = vld [vmem:[%s1801_s1 + $0xa4] ss:$16 sps:$4 sm:$0xff]   ;;  %v1168_v11 = vld [vmem:[%s1801_s1 + $0xa0] ss:$16 sps:$4 sm:$0xff]   ;;  %v1202_v54 = vld [vmem:[%s1801_s1 + $0x28] ss:$16 sps:$4 sm:$0xff]  }
   0x7   :  { %410 = vmatpush1.bf16.msra.mxu1 %v1156_v3  ;;  %v1169_v12 = vld [vmem:[%s1801_s1 + $0xc4] ss:$16 sps:$4 sm:$0xff]   ;;  %v1171_v16 = vld [vmem:[%s1801_s1 + $0xc0] ss:$16 sps:$4 sm:$0xff]   ;;  %v1207_v55 = vld [vmem:[%s1801_s1 + $0x4c] ss:$16 sps:$4 sm:$0xff]  }
   0x8   :  { %411 = vmatprep.subr.bf16.mxu1 %v1157_v4  ;;  %v1172_v17 = vld [vmem:[%s1801_s1 + $0xe4] ss:$16 sps:$4 sm:$0xff]   ;;  %v1174_v18 = vld [vmem:[%s1801_s1 + $0xe0] ss:$16 sps:$4 sm:$0xff]   ;;  %v1205_v58 = vld [vmem:[%s1801_s1 + $0x48] ss:$16 sps:$4 sm:$0xff]  }
   0x9   :  { %v1175_v19 = vld [vmem:[%s1801_s1 + $0x104] ss:$16 sps:$4 sm:$0xff]   ;;  %v1177_v20 = vld [vmem:[%s1801_s1 + $0x100] ss:$16 sps:$4 sm:$0xff]   ;;  %v1210_v59 = vld [vmem:[%s1801_s1 + $0x6c] ss:$16 sps:$4 sm:$0xff]  }
   0xa   :  { %v1178_v21 = vld [vmem:[%s1801_s1 + $0x124] ss:$16 sps:$4 sm:$0xff]   ;;  %v1180_v22 = vld [vmem:[%s1801_s1 + $0x120] ss:$16 sps:$4 sm:$0xff]   ;;  %v1208_v62 = vld [vmem:[%s1801_s1 + $0x68] ss:$16 sps:$4 sm:$0xff]  }
   0xb   :  { %412 = vmatpush1.bf16.msra.mxu1 %v1159_v5  ;;  %v1181_v23 = vld [vmem:[%s1801_s1 + $0x144] ss:$16 sps:$4 sm:$0xff]   ;;  %v1183_v24 = vld [vmem:[%s1801_s1 + $0x140] ss:$16 sps:$4 sm:$0xff]   ;;  %v1213_v63 = vld [vmem:[%s1801_s1 + $0x8c] ss:$16 sps:$4 sm:$0xff]  }
   0xc   :  { %413 = vmatprep.subr.bf16.mxu1 %v1160_v6  ;;  %v1184_v25 = vld [vmem:[%s1801_s1 + $0x164] ss:$16 sps:$4 sm:$0xff]   ;;  %v1186_v26 = vld [vmem:[%s1801_s1 + $0x160] ss:$16 sps:$4 sm:$0xff]   ;;  %v1211_v2 = vld [vmem:[%s1801_s1 + $0x88] ss:$16 sps:$4 sm:$0xff]  }
   0xd   :  { %v1187_v27 = vld [vmem:[%s1801_s1 + $0x184] ss:$16 sps:$4 sm:$0xff]   ;;  %v1249_v29 = vld [vmem:[%s1803_s2] ss:$8 sps:$4 sm:$0xff]   ;;  %v1252_v33 = vld [vmem:[%s1803_s2 + $0x10] ss:$8 sps:$4 sm:$0xff]  }
   0xe   :  { %v1247_v28 = vld [vmem:[%s1803_s2 + $0x4] ss:$8 sps:$4 sm:$0xff]   ;;  %v1189_v30 = vld [vmem:[%s1801_s1 + $0x180] ss:$16 sps:$4 sm:$0xff]   ;;  %v1250_v31 = vld [vmem:[%s1803_s2 + $0x14] ss:$8 sps:$4 sm:$0xff]  }
   0xf   :  { %414 = vmatpush1.bf16.msra.mxu1 %v1162_v7  ;;  %905 = vmatprep.subr.bf16.mxu0 %v1247_v28  ;;  %v1190_v32 = vld [vmem:[%s1801_s1 + $0x1a4] ss:$16 sps:$4 sm:$0xff]   ;;  %v1192_v35 = vld [vmem:[%s1801_s1 + $0x1a0] ss:$16 sps:$4 sm:$0xff]   ;;  %v1216_v3 = vld [vmem:[%s1801_s1 + $0xac] ss:$16 sps:$4 sm:$0xff]  }
  0x10   :  { %415 = vmatprep.subr.bf16.mxu1 %v1163_v8  ;;  %906 = vmatpush1.bf16.msra.mxu0 %v1249_v29  ;;  %v1253_v34 = vld [vmem:[%s1803_s2 + $0x24] ss:$8 sps:$4 sm:$0xff]   ;;  %v1255_v37 = vld [vmem:[%s1803_s2 + $0x20] ss:$8 sps:$4 sm:$0xff]   ;;  %v1256_v38 = vld [vmem:[%s1803_s2 + $0x34] ss:$8 sps:$4 sm:$0xff]  }
  0x11   :  { %907 = vmatprep.subr.bf16.mxu0 %v1250_v31  ;;  %v1193_v36 = vld [vmem:[%s1801_s1 + $0x1c4] ss:$16 sps:$4 sm:$0xff]   ;;  %v1195_v39 = vld [vmem:[%s1801_s1 + $0x1c0] ss:$16 sps:$4 sm:$0xff]   ;;  %v1214_v6 = vld [vmem:[%s1801_s1 + $0xa8] ss:$16 sps:$4 sm:$0xff]  }
  0x12   :  { %v1196_v40 = vld [vmem:[%s1801_s1 + $0x1e4] ss:$16 sps:$4 sm:$0xff]   ;;  %v1258_v41 = vld [vmem:[%s1803_s2 + $0x30] ss:$8 sps:$4 sm:$0xff]   ;;  %v1261_v47 = vld [vmem:[%s1803_s2 + $0x40] ss:$8 sps:$4 sm:$0xff]  }
  0x13   :  { %416 = vmatpush1.bf16.msra.mxu1 %v1165_v9  ;;  %v1259_v42 = vld [vmem:[%s1803_s2 + $0x44] ss:$8 sps:$4 sm:$0xff]   ;;  %v1198_v43 = vld [vmem:[%s1801_s1 + $0x1e0] ss:$16 sps:$4 sm:$0xff]   ;;  %v1262_v48 = vld [vmem:[%s1803_s2 + $0x54] ss:$8 sps:$4 sm:$0xff]  }
  0x14   :  { %417 = vmatprep.subr.bf16.mxu1 %v1166_v10  ;;  %908 = vmatpush1.bf16.msra.mxu0 %v1252_v33  ;;  %v17_v44 = vld [vmem:[%s1802_s0] sm:$0xff]  ;;  %v19_v45 = vld [vmem:[%s1802_s0 + $0x10] sm:$0xff]  ;;  %v1219_v7 = vld [vmem:[%s1801_s1 + $0xcc] ss:$16 sps:$4 sm:$0xff]  }
  0x15   :  { %909 = vmatprep.subr.bf16.mxu0 %v1253_v34  ;;  %v1523_v50 = vpack.c.bf16 %v19_v45, %v17_v44  ;;  %v1264_v52 = vld [vmem:[%s1803_s2 + $0x50] ss:$8 sps:$4 sm:$0xff]   ;;  %v1265_v53 = vld [vmem:[%s1803_s2 + $0x64] ss:$8 sps:$4 sm:$0xff]   ;;  %v1267_v56 = vld [vmem:[%s1803_s2 + $0x60] ss:$8 sps:$4 sm:$0xff]  }
  0x16   :  { %v1268_v57 = vld [vmem:[%s1803_s2 + $0x74] ss:$8 sps:$4 sm:$0xff]   ;;  %v1270_v60 = vld [vmem:[%s1803_s2 + $0x70] ss:$8 sps:$4 sm:$0xff]   ;;  %v1271_v61 = vld [vmem:[%s1803_s2 + $0x84] ss:$8 sps:$4 sm:$0xff]  }
  0x17   :  { %418 = vmatpush1.bf16.msra.mxu1 %v1168_v11  ;;  %v1273_v0 = vld [vmem:[%s1803_s2 + $0x80] ss:$8 sps:$4 sm:$0xff]   ;;  %v1274_v1 = vld [vmem:[%s1803_s2 + $0x94] ss:$8 sps:$4 sm:$0xff]   ;;  %v1276_v4 = vld [vmem:[%s1803_s2 + $0x90] ss:$8 sps:$4 sm:$0xff]  }
  0x18   :  { %419 = vmatprep.subr.bf16.mxu1 %v1169_v12  ;;  %910 = vmatpush1.bf16.msra.mxu0 %v1255_v37  ;;  %v1277_v5 = vld [vmem:[%s1803_s2 + $0xa4] ss:$8 sps:$4 sm:$0xff]   ;;  %v1279_v8 = vld [vmem:[%s1803_s2 + $0xa0] ss:$8 sps:$4 sm:$0xff]   ;;  %v1280_v9 = vld [vmem:[%s1803_s2 + $0xb4] ss:$8 sps:$4 sm:$0xff]  }
  0x19   :  { %911 = vmatprep.subr.bf16.mxu0 %v1256_v38  ;;  %v1217_v10 = vld [vmem:[%s1801_s1 + $0xc8] ss:$16 sps:$4 sm:$0xff]   ;;  %v1222_v11 = vld [vmem:[%s1801_s1 + $0xec] ss:$16 sps:$4 sm:$0xff]  }
  0x1a   :  { %v1282_v12 = vld [vmem:[%s1803_s2 + $0xb0] ss:$8 sps:$4 sm:$0xff]   ;;  %v1283_v13 = vld [vmem:[%s1803_s2 + $0xc4] ss:$8 sps:$4 sm:$0xff]  }
  0x1b   :  { %420 = vmatpush1.bf16.msra.mxu1 %v1171_v16  ;;  %v1220_v14 = vld [vmem:[%s1801_s1 + $0xe8] ss:$16 sps:$4 sm:$0xff]   ;;  %v1240_v28 = vld [vmem:[%s1801_s1 + $0x1ac] ss:$16 sps:$4 sm:$0xff]  }
  0x1c   :  { %421 = vmatprep.subr.bf16.mxu1 %v1172_v17  ;;  %912 = vmatpush1.bf16.msra.mxu0 %v1258_v41  ;;  %v1285_v16 = vld [vmem:[%s1803_s2 + $0xc0] ss:$8 sps:$4 sm:$0xff]   ;;  %v1286_v17 = vld [vmem:[%s1803_s2 + $0xd4] ss:$8 sps:$4 sm:$0xff]   ;;  %v1289_v34 = vld [vmem:[%s1803_s2 + $0xe4] ss:$8 sps:$4 sm:$0xff]  }
  0x1d   :  { %913 = vmatprep.subr.bf16.mxu0 %v1259_v42  ;;  %v1238_v29 = vld [vmem:[%s1801_s1 + $0x1a8] ss:$16 sps:$4 sm:$0xff]   ;;  %v1297_v38 = vld [vmem:[%s1803_s2 + $0x104] ss:$8 sps:$4 sm:$0xff]  }
  0x1e   :  { %v1241_v31 = vld [vmem:[%s1801_s1 + $0x1c8] ss:$16 sps:$4 sm:$0xff]  }
  0x1f   :  { %422 = vmatpush1.bf16.msra.mxu1 %v1174_v18  ;;  %v1223_v18 = vld [vmem:[%s1801_s1 + $0x108] ss:$16 sps:$4 sm:$0xff]  }
  0x20   :  { %423 = vmatprep.subr.bf16.mxu1 %v1175_v19  ;;  %914 = vmatpush1.bf16.msra.mxu0 %v1261_v47  ;;  %v1228_v19 = vld [vmem:[%s1801_s1 + $0x12c] ss:$16 sps:$4 sm:$0xff]   ;;  %v1244_v33 = vld [vmem:[%s1801_s1 + $0x1e8] ss:$16 sps:$4 sm:$0xff]  }
  0x21   :  { %915 = vmatprep.subr.bf16.mxu0 %v1262_v48  ;;  %v1294_v37 = vld [vmem:[%s1803_s2 + $0xf0] ss:$8 sps:$4 sm:$0xff]  }
  0x23   :  { %424 = vmatpush1.bf16.msra.mxu1 %v1177_v20  ;;  %v1288_v20 = vld [vmem:[%s1803_s2 + $0xd0] ss:$8 sps:$4 sm:$0xff]  }
  0x24   :  { %425 = vmatprep.subr.bf16.mxu1 %v1178_v21  ;;  %916 = vmatpush1.bf16.msra.mxu0 %v1264_v52  ;;  %v1226_v21 = vld [vmem:[%s1801_s1 + $0x128] ss:$16 sps:$4 sm:$0xff]  }
  0x25   :  { %917 = vmatprep.subr.bf16.mxu0 %v1265_v53  ;;  %v1295_v53 = vld [vmem:[%s1803_s2 + $0x100] ss:$8 sps:$4 sm:$0xff]  }
  0x27   :  { %426 = vmatpush1.bf16.msra.mxu1 %v1180_v22  ;;  %v1231_v22 = vld [vmem:[%s1801_s1 + $0x14c] ss:$16 sps:$4 sm:$0xff]  }
  0x28   :  { %427 = vmatprep.subr.bf16.mxu1 %v1181_v23  ;;  %918 = vmatpush1.bf16.msra.mxu0 %v1267_v56  ;;  %v1229_v23 = vld [vmem:[%s1801_s1 + $0x148] ss:$16 sps:$4 sm:$0xff]   ;;  %v1303_v56 = vld [vmem:[%s1803_s2 + $0x124] ss:$8 sps:$4 sm:$0xff]  }
  0x29   :  { %919 = vmatprep.subr.bf16.mxu0 %v1268_v57  ;;  %v1301_v57 = vld [vmem:[%s1803_s2 + $0x120] ss:$8 sps:$4 sm:$0xff]  }
  0x2b   :  { %428 = vmatpush1.bf16.msra.mxu1 %v1183_v24  ;;  %v1234_v24 = vld [vmem:[%s1801_s1 + $0x16c] ss:$16 sps:$4 sm:$0xff]  }
  0x2c   :  { %429 = vmatprep.subr.bf16.mxu1 %v1184_v25  ;;  %920 = vmatpush1.bf16.msra.mxu0 %v1270_v60  ;;  %v1232_v25 = vld [vmem:[%s1801_s1 + $0x168] ss:$16 sps:$4 sm:$0xff]   ;;  %v1309_v60 = vld [vmem:[%s1803_s2 + $0x144] ss:$8 sps:$4 sm:$0xff]  }
  0x2d   :  { %921 = vmatprep.subr.bf16.mxu0 %v1271_v61  ;;  %v1307_v61 = vld [vmem:[%s1803_s2 + $0x140] ss:$8 sps:$4 sm:$0xff]  }
  0x2f   :  { %430 = vmatpush1.bf16.msra.mxu1 %v1186_v26  ;;  %v1237_v26 = vld [vmem:[%s1801_s1 + $0x18c] ss:$16 sps:$4 sm:$0xff]  }
  0x30   :  { %431 = vmatprep.subr.bf16.mxu1 %v1187_v27  ;;  %922 = vmatpush1.bf16.msra.mxu0 %v1273_v0  ;;  %v1235_v27 = vld [vmem:[%s1801_s1 + $0x188] ss:$16 sps:$4 sm:$0xff]   ;;  %v1315_v0 = vld [vmem:[%s1803_s2 + $0x164] ss:$8 sps:$4 sm:$0xff]  }
  0x31   :  { %923 = vmatprep.subr.bf16.mxu0 %v1274_v1  ;;  %v1313_v1 = vld [vmem:[%s1803_s2 + $0x160] ss:$8 sps:$4 sm:$0xff]  }
  0x33   :  { %432 = vmatpush1.bf16.msra.mxu1 %v1189_v30  ;;  %v1243_v30 = vld [vmem:[%s1801_s1 + $0x1cc] ss:$16 sps:$4 sm:$0xff]  }
  0x34   :  { %433 = vmatprep.subr.bf16.mxu1 %v1190_v32  ;;  %924 = vmatpush1.bf16.msra.mxu0 %v1276_v4  ;;  %v1246_v32 = vld [vmem:[%s1801_s1 + $0x1ec] ss:$16 sps:$4 sm:$0xff]  }
  0x35   :  { %925 = vmatprep.subr.bf16.mxu0 %v1277_v5  ;;  %v1321_v4 = vld [vmem:[%s1803_s2 + $0x184] ss:$8 sps:$4 sm:$0xff]   ;;  %v1319_v5 = vld [vmem:[%s1803_s2 + $0x180] ss:$8 sps:$4 sm:$0xff]  }
  0x37   :  { %434 = vmatpush1.bf16.msra.mxu1 %v1192_v35  ;;  %v1291_v35 = vld [vmem:[%s1803_s2 + $0xe0] ss:$8 sps:$4 sm:$0xff]  }
  0x38   :  { %435 = vmatprep.subr.bf16.mxu1 %v1193_v36  ;;  %926 = vmatpush1.bf16.msra.mxu0 %v1279_v8  ;;  %v1292_v36 = vld [vmem:[%s1803_s2 + $0xf4] ss:$8 sps:$4 sm:$0xff]   ;;  %v1327_v8 = vld [vmem:[%s1803_s2 + $0x1a4] ss:$8 sps:$4 sm:$0xff]  }
  0x39   :  { %927 = vmatprep.subr.bf16.mxu0 %v1280_v9  ;;  %v1325_v9 = vld [vmem:[%s1803_s2 + $0x1a0] ss:$8 sps:$4 sm:$0xff]  }
  0x3b   :  { %436 = vmatpush1.bf16.msra.mxu1 %v1195_v39 }
  0x3c   :  { %437 = vmatprep.subr.bf16.mxu1 %v1196_v40  ;;  %928 = vmatpush1.bf16.msra.mxu0 %v1282_v12  ;;  %v1333_v12 = vld [vmem:[%s1803_s2 + $0x1c4] ss:$8 sps:$4 sm:$0xff]  }
  0x3d   :  { %929 = vmatprep.subr.bf16.mxu0 %v1283_v13  ;;  %v1331_v13 = vld [vmem:[%s1803_s2 + $0x1c0] ss:$8 sps:$4 sm:$0xff]  }
  0x3f   :  { %438 = vmatpush1.bf16.msra.mxu1 %v1198_v43 }
  0x40   :  { %450 = vmatprep.subr.bf16.mxu1 %v1201_v46  ;;  %930 = vmatpush1.bf16.msra.mxu0 %v1285_v16  ;;  %v1339_v16 = vld [vmem:[%s1803_s2 + $0x1e4] ss:$8 sps:$4 sm:$0xff]  }
  0x41   :  { %931 = vmatprep.subr.bf16.mxu0 %v1286_v17  ;;  %v1337_v17 = vld [vmem:[%s1803_s2 + $0x1e0] ss:$8 sps:$4 sm:$0xff]  }
  0x42   :  { %440 = vmatmul.mubr.bf16.vlgmr.msra.gmra.mrb[0].mxu1 %v1523_v50 }
  0x43   :  { %451 = vmatpush1.bf16.msra.mxu1 %v1199_v49  ;;  %482 = vmatprep.mubr.bf16.mxu1 %v1418_v15  ;;  %v1225_v15 = vld [vmem:[%s1801_s1 + $0x10c] ss:$16 sps:$4 sm:$0xff]  }
  0x44   :  { %452 = vmatprep.subr.bf16.mxu1 %v1204_v51  ;;  %932 = vmatpush1.bf16.msra.mxu0 %v1288_v20 }
  0x45   :  { %933 = vmatprep.subr.bf16.mxu0 %v1289_v34 }
  0x47   :  { %453 = vmatpush1.bf16.msra.mxu1 %v1202_v54  ;;  %v1300_v54 = vld [vmem:[%s1803_s2 + $0x114] ss:$8 sps:$4 sm:$0xff]  }
  0x48   :  { %454 = vmatprep.subr.bf16.mxu1 %v1207_v55  ;;  %934 = vmatpush1.bf16.msra.mxu0 %v1291_v35  ;;  %v1298_v55 = vld [vmem:[%s1803_s2 + $0x110] ss:$8 sps:$4 sm:$0xff]  }
  0x49   :  { %935 = vmatprep.subr.bf16.mxu0 %v1292_v36 }
  0x4b   :  { %455 = vmatpush1.bf16.msra.mxu1 %v1205_v58  ;;  %v1306_v58 = vld [vmem:[%s1803_s2 + $0x134] ss:$8 sps:$4 sm:$0xff]  }
  0x4c   :  { %456 = vmatprep.subr.bf16.mxu1 %v1210_v59  ;;  %936 = vmatpush1.bf16.msra.mxu0 %v1294_v37  ;;  %v1304_v59 = vld [vmem:[%s1803_s2 + $0x130] ss:$8 sps:$4 sm:$0xff]  }
  0x4d   :  { %948 = vmatprep.subr.bf16.mxu0 %v1297_v38 }
  0x4f   :  { %457 = vmatpush1.bf16.msra.mxu1 %v1208_v62  ;;  %v1312_v62 = vld [vmem:[%s1803_s2 + $0x154] ss:$8 sps:$4 sm:$0xff]  }
  0x50   :  { %458 = vmatprep.subr.bf16.mxu1 %v1213_v63  ;;  %v1310_v63 = vld [vmem:[%s1803_s2 + $0x150] ss:$8 sps:$4 sm:$0xff]  }
  0x53   :  { %459 = vmatpush1.bf16.msra.mxu1 %v1211_v2  ;;  %v1318_v2 = vld [vmem:[%s1803_s2 + $0x174] ss:$8 sps:$4 sm:$0xff]  }
  0x54   :  { %460 = vmatprep.subr.bf16.mxu1 %v1216_v3  ;;  %v1316_v3 = vld [vmem:[%s1803_s2 + $0x170] ss:$8 sps:$4 sm:$0xff]  }
  0x57   :  { %461 = vmatpush1.bf16.msra.mxu1 %v1214_v6  ;;  %v1324_v6 = vld [vmem:[%s1803_s2 + $0x194] ss:$8 sps:$4 sm:$0xff]  }
  0x58   :  { %462 = vmatprep.subr.bf16.mxu1 %v1219_v7  ;;  %v1322_v7 = vld [vmem:[%s1803_s2 + $0x190] ss:$8 sps:$4 sm:$0xff]  }
  0x5b   :  { %463 = vmatpush1.bf16.msra.mxu1 %v1217_v10  ;;  %v1330_v10 = vld [vmem:[%s1803_s2 + $0x1b4] ss:$8 sps:$4 sm:$0xff]  }
  0x5c   :  { %464 = vmatprep.subr.bf16.mxu1 %v1222_v11  ;;  %v1328_v11 = vld [vmem:[%s1803_s2 + $0x1b0] ss:$8 sps:$4 sm:$0xff]  }
  0x5f   :  { %465 = vmatpush1.bf16.msra.mxu1 %v1220_v14  ;;  %v1336_v14 = vld [vmem:[%s1803_s2 + $0x1d4] ss:$8 sps:$4 sm:$0xff]  }
  0x60   :  { %466 = vmatprep.subr.bf16.mxu1 %v1225_v15  ;;  %v1334_v15 = vld [vmem:[%s1803_s2 + $0x1d0] ss:$8 sps:$4 sm:$0xff]  }
  0x63   :  { %467 = vmatpush1.bf16.msra.mxu1 %v1223_v18 }
  0x64   :  { %468 = vmatprep.subr.bf16.mxu1 %v1228_v19  ;;  %v1342_v19 = vld [vmem:[%s1803_s2 + $0x1f4] ss:$8 sps:$4 sm:$0xff]  }
  0x67   :  { %469 = vmatpush1.bf16.msra.mxu1 %v1226_v21 }
  0x68   :  { %470 = vmatprep.subr.bf16.mxu1 %v1231_v22 }
  0x6b   :  { %471 = vmatpush1.bf16.msra.mxu1 %v1229_v23 }
  0x6c   :  { %472 = vmatprep.subr.bf16.mxu1 %v1234_v24  ;;  %v1340_v24 = vld [vmem:[%s1803_s2 + $0x1f0] ss:$8 sps:$4 sm:$0xff]  }
  0x6f   :  { %473 = vmatpush1.bf16.msra.mxu1 %v1232_v25 }
  0x70   :  { %474 = vmatprep.subr.bf16.mxu1 %v1237_v26 }
  0x73   :  { %475 = vmatpush1.bf16.msra.mxu1 %v1235_v27 }
  0x74   :  { %476 = vmatprep.subr.bf16.mxu1 %v1240_v28 }
  0x77   :  { %477 = vmatpush1.bf16.msra.mxu1 %v1238_v29 }
  0x78   :  { %478 = vmatprep.subr.bf16.mxu1 %v1243_v30 }
  0x7b   :  { %479 = vmatpush1.bf16.msra.mxu1 %v1241_v31 }
  0x7c   :  { %480 = vmatprep.subr.bf16.mxu1 %v1246_v32 }
  0x7f   :  { %481 = vmatpush1.bf16.msra.mxu1 %v1244_v33 }
  0x82   :  { %483 = vmatmul.mubr.bf16.vlgmr.msra.gmra.mrb[4].mxu1 %v1523_v50 }
 0x115   :  { %v441_v39 = vpop.f32.mrb[0].mxu1 }
 0x116   :  { %v501_v40 = vmul.f32 0.2, %v441_v39  ;;  %v443_v41 = vpop.f32.mrb[1].mxu1  ;;  %vm493_vm0 = vcmp.gt.f32.partialorder %v441_v39, 0.0 }
 0x117   :  { %v502_v42 = vmul.f32 0.2, %v443_v41  ;;  %v445_v43 = vpop.f32.mrb[2].mxu1  ;;  %vm494_vm2 = vcmp.gt.f32.partialorder %v443_v41, 0.0 }
 0x118   :  { %vm497_vm1 = vcmp.gt.f32.partialorder %v445_v43, 0.0  ;;  %v505_v44 = vmul.f32 0.2, %v445_v43  ;;  %v447_v45 = vpop.f32.mrb[3].mxu1  ;;  %v509_v47 = vsel %vm493_vm0, %v441_v39, %v501_v40 }
 0x119   :  { %v506_v46 = vmul.f32 0.2, %v447_v45  ;;  %vm498_vm3 = vcmp.gt.f32.partialorder %v447_v45, 0.0  ;;  %v510_v49 = vsel %vm494_vm2, %v443_v41, %v502_v42 }
 0x11a   :  { %v513_v48 = vsel %vm497_vm1, %v445_v43, %v505_v44 }
 0x11b   :  { %v514_v50 = vsel %vm498_vm3, %v447_v45, %v506_v46  ;;  %v517_v51 = vpack.c.bf16 %v513_v48, %v509_v47 }
 0x11c   :  { %v518_v52 = vpack.c.bf16 %v514_v50, %v510_v49 }
 0x11e   :  { %937 = vmatprep.mubr.bf16.mxu0 %v518_v52 }
 0x11f   :  { %938 = vmatmul.mubr.bf16.vlgmr.msra.gmra.mrb[0].mxu0 %v517_v51 }
 0x120   :  { %949 = vmatpush1.bf16.msra.mxu0 %v1295_v53 }
 0x121   :  { %950 = vmatprep.subr.bf16.mxu0 %v1300_v54 }
 0x124   :  { %951 = vmatpush1.bf16.msra.mxu0 %v1298_v55 }
 0x125   :  { %952 = vmatprep.subr.bf16.mxu0 %v1303_v56 }
 0x128   :  { %953 = vmatpush1.bf16.msra.mxu0 %v1301_v57 }
 0x129   :  { %954 = vmatprep.subr.bf16.mxu0 %v1306_v58 }
 0x12c   :  { %955 = vmatpush1.bf16.msra.mxu0 %v1304_v59 }
 0x12d   :  { %956 = vmatprep.subr.bf16.mxu0 %v1309_v60 }
 0x130   :  { %957 = vmatpush1.bf16.msra.mxu0 %v1307_v61 }
 0x131   :  { %958 = vmatprep.subr.bf16.mxu0 %v1312_v62 }
 0x134   :  { %959 = vmatpush1.bf16.msra.mxu0 %v1310_v63 }
 0x135   :  { %960 = vmatprep.subr.bf16.mxu0 %v1315_v0 }
 0x138   :  { %961 = vmatpush1.bf16.msra.mxu0 %v1313_v1 }
 0x139   :  { %962 = vmatprep.subr.bf16.mxu0 %v1318_v2 }
 0x13c   :  { %963 = vmatpush1.bf16.msra.mxu0 %v1316_v3 }
 0x13d   :  { %964 = vmatprep.subr.bf16.mxu0 %v1321_v4 }
 0x140   :  { %965 = vmatpush1.bf16.msra.mxu0 %v1319_v5 }
 0x141   :  { %966 = vmatprep.subr.bf16.mxu0 %v1324_v6 }
 0x144   :  { %967 = vmatpush1.bf16.msra.mxu0 %v1322_v7 }
 0x145   :  { %968 = vmatprep.subr.bf16.mxu0 %v1327_v8 }
 0x148   :  { %969 = vmatpush1.bf16.msra.mxu0 %v1325_v9 }
 0x149   :  { %970 = vmatprep.subr.bf16.mxu0 %v1330_v10 }
 0x14c   :  { %971 = vmatpush1.bf16.msra.mxu0 %v1328_v11 }
 0x14d   :  { %972 = vmatprep.subr.bf16.mxu0 %v1333_v12 }
 0x150   :  { %973 = vmatpush1.bf16.msra.mxu0 %v1331_v13 }
 0x151   :  { %974 = vmatprep.subr.bf16.mxu0 %v1336_v14 }
 0x154   :  { %975 = vmatpush1.bf16.msra.mxu0 %v1334_v15 }
 0x155   :  { %v484_v18 = vpop.f32.mrb[4].mxu1  ;;  %976 = vmatprep.subr.bf16.mxu0 %v1339_v16 }
 0x156   :  { %v503_v20 = vmul.f32 0.2, %v484_v18  ;;  %v486_v21 = vpop.f32.mrb[5].mxu1  ;;  %vm495_vm4 = vcmp.gt.f32.partialorder %v484_v18, 0.0 }
 0x157   :  { %v504_v22 = vmul.f32 0.2, %v486_v21  ;;  %v488_v23 = vpop.f32.mrb[6].mxu1  ;;  %vm496_vm5 = vcmp.gt.f32.partialorder %v486_v21, 0.0 }
 0x158   :  { %vm499_vm6 = vcmp.gt.f32.partialorder %v488_v23, 0.0  ;;  %v507_v25 = vmul.f32 0.2, %v488_v23  ;;  %v490_v26 = vpop.f32.mrb[7].mxu1  ;;  %977 = vmatpush1.bf16.msra.mxu0 %v1337_v17  ;;  %v511_v28 = vsel %vm495_vm4, %v484_v18, %v503_v20 }
 0x159   :  { %vm500_vm7 = vcmp.gt.f32.partialorder %v490_v26, 0.0  ;;  %v508_v27 = vmul.f32 0.2, %v490_v26  ;;  %978 = vmatprep.subr.bf16.mxu0 %v1342_v19  ;;  %v512_v30 = vsel %vm496_vm5, %v486_v21, %v504_v22 }
 0x15a   :  { %v515_v29 = vsel %vm499_vm6, %v488_v23, %v507_v25 }
 0x15b   :  { %v519_v31 = vpack.c.bf16 %v515_v29, %v511_v28  ;;  %v516_v32 = vsel %vm500_vm7, %v490_v26, %v508_v27 }
 0x15c   :  { %v520_v33 = vpack.c.bf16 %v516_v32, %v512_v30  ;;  %979 = vmatpush1.bf16.msra.mxu0 %v1340_v24 }
 0x15e   :  { %980 = vmatprep.mubr.bf16.mxu0 %v520_v33 }
 0x15f   :  { %981 = vmatmul.mubr.bf16.vlgmr.msra.gmra.mrb[0].mxu0 %v519_v31 }
 0x232   :  { %v982_v34 = vpop.f32.mrb[0].mxu0 }
 0x233   :  { %991 = vst [vmem:[%s1804_s3] sm:$0xff] %v982_v34  ;;  %v984_v35 = vpop.f32.mrb[1].mxu0  ;;  %v999_v37 = vmul.f32 %v982_v34, %v982_v34 }
 0x234   :  { %992 = vst [vmem:[%s1804_s3 + $0x8] sm:$0xff] %v984_v35  ;;  %v986_v36 = vpop.f32.mrb[2].mxu0  ;;  %v1000_v41 = vmul.f32 %v984_v35, %v984_v35 }
 0x235   :  { %993 = vst [vmem:[%s1804_s3 + $0x10] sm:$0xff] %v986_v36  ;;  %v995_v38 = vadd.f32 %v986_v36, %v982_v34  ;;  %v1001_v39 = vmul.f32 %v986_v36, %v986_v36  ;;  %v988_v40 = vpop.f32.mrb[3].mxu0 }
 0x236   :  { %994 = vst [vmem:[%s1804_s3 + $0x18] sm:$0xff] %v988_v40  ;;  %v996_v42 = vadd.f32 %v988_v40, %v984_v35  ;;  %v1002_v43 = vmul.f32 %v988_v40, %v988_v40 }
 0x237   :  { %v1003_v44 = vadd.f32 %v1001_v39, %v999_v37  ;;  %997 = vst [vmem:[%s1805_s4] sm:$0xff] %v995_v38 }
 0x238   :  { %998 = vst [vmem:[%s1805_s4 + $0x8] sm:$0xff] %v996_v42  ;;  %v1004_v45 = vadd.f32 %v1002_v43, %v1000_v41 }
 0x239   :  { %1005 = vst [vmem:[%s1806_s5] sm:$0xff] %v1003_v44 }
 0x23a   :  { %1006 = vst [vmem:[%s1806_s5 + $0x8] sm:$0xff] %v1004_v45 }

</bundles_post_ra>
